<compile_context>
chip_gen: v5e
topology: v5e:2x2
jax: 0.10.0
libtpu: 0.0.40
codegen_flags: <defaults>
</compile_context>

<pallas_src>
from math import exp

import jax
import jax.numpy as jnp
import numpy as np
from jax.experimental import pallas as pl
from jax.experimental.pallas import tpu as pltpu


# ----------------------------- window setup ------------------------------- #
def _gaussian_1d(window_size: int, sigma: float = 1.5) -> np.ndarray:
    """Same construction as gaussian() in the PyTorch code (normalized 1D)."""
    g = np.array(
        [exp(-((x - window_size // 2) ** 2) / float(2 * sigma ** 2))
         for x in range(window_size)],
        dtype=np.float64,
    )
    return (g / g.sum()).astype(np.float32)


def _band_matrix(n: int, w1d: np.ndarray, pad: int) -> np.ndarray:
    """M[i, j] = w1d[j - i + pad] (zero outside the band) -> 'same' conv."""
    ws = w1d.shape[0]
    i = np.arange(n)[:, None]
    j = np.arange(n)[None, :]
    k = j - i + pad
    valid = (k >= 0) & (k < ws)
    m = np.where(valid, w1d[np.clip(k, 0, ws - 1)], np.float32(0.0))
    return m.astype(np.float32)


# ------------------------------ Pallas kernel ------------------------------ #
def _ssim_kernel(a_ref, bw_ref, x1_ref, x2_ref, out_ref):
    C1 = 0.01 ** 2
    C2 = 0.03 ** 2

    A = a_ref[...]          # (H, H)  row-pass banded Gaussian (padding folded)
    Bw = bw_ref[...]        # (W, W)  column-pass banded Gaussian
    x1 = x1_ref[...]        # (P, H, W)  P channel-planes of img1
    x2 = x2_ref[...]        # (P, H, W)  P channel-planes of img2
    P, H, W = x1.shape

    # Hoisted once per grid step (tiny).
    A_b = jnp.broadcast_to(A[None, :, :], (P, H, H))

    def gconv(x):
        # Column pass (contract W): one matmul for all planes at once.
        y = jnp.dot(x.reshape(P * H, W), Bw,
                    preferred_element_type=jnp.float32).reshape(P, H, W)
        # Row pass (contract H): batched per-plane matmul on the MXU.
        return jnp.einsum('puh,phw->puw', A_b, y,
                          preferred_element_type=jnp.float32)

    mu1 = gconv(x1)
    mu2 = gconv(x2)
    s11 = gconv(x1 * x1)
    s22 = gconv(x2 * x2)
    s12 = gconv(x1 * x2)

    mu1_sq = mu1 * mu1
    mu2_sq = mu2 * mu2
    mu1_mu2 = mu1 * mu2
    sigma1_sq = s11 - mu1_sq
    sigma2_sq = s22 - mu2_sq
    sigma12 = s12 - mu1_mu2

    num = (2.0 * mu1_mu2 + C1) * (2.0 * sigma12 + C2)
    den = (mu1_sq + mu2_sq + C1) * (sigma1_sq + sigma2_sq + C2)
    ssim_map = num * pl.reciprocal(den, approx=False)       # (P, H, W)

    # Per-plane sums on the XLU (no MXU, no selector constant).
    t = jnp.sum(ssim_map, axis=2)                           # (P, H)
    out_ref[0] = jnp.sum(t, axis=1, keepdims=True)          # (P, 1)


# ------------------------------ JAX wrapper -------------------------------- #
def _choose_p(nc: int, h: int, w: int) -> int:
    """Planes per grid step: keep VMEM small; keep >= 2 grid steps (v7x)."""
    lane_w = max(w, 128)                           # lane padding of (P,H,W)
    p_vmem = max(1, (256 * 1024) // (h * lane_w))  # ~<= 16 MiB of live f32
    p = min(nc, p_vmem)
    if nc >= 2:
        p = min(p, -(-nc // 2))                    # at least 2 grid steps
    return max(1, p)


def ssim_pallas(img1, img2, window_size=11, size_average=True):
    assert img1.shape == img2.shape and img1.ndim == 4
    N, C, H, W = img1.shape
    NC = N * C
    pad = window_size // 2
    w1d = _gaussian_1d(window_size)

    # Compile-time banded 'same'-conv matrices (zero padding folded in).
    A = _band_matrix(H, w1d, pad)            # row pass:    A @ x
    Bw = _band_matrix(W, w1d, pad).T         # column pass: x @ Bw

    P = _choose_p(NC, H, W)
    num_blocks = -(-NC // P)
    NC_pad = num_blocks * P

    def pack(img):
        # Pure reshape of NCHW -> (NC, H, W): no transpose, no extra HBM pass.
        x = img.astype(jnp.float32).reshape(NC, H, W)
        if NC_pad > NC:
            x = jnp.pad(x, ((0, NC_pad - NC), (0, 0), (0, 0)))
        return x

    x1p = pack(img1)
    x2p = pack(img2)

    # VMEM budget estimate (double-buffered inputs + constants + live temps),
    # capped at 48 MiB to leave headroom on v7x's 64 MiB physical VMEM.
    lane_w = max(W, 128)
    est = 4 * (4 * P * H * lane_w            # 2 inputs x 2 pipeline buffers
               + H * H + W * W + P * H * H   # constants (+ in-kernel bcast)
               + 16 * P * H * lane_w)        # live f32 intermediates
    vmem_limit = int(min(48 * 1024 * 1024, max(32 * 1024 * 1024, 2 * est)))

    out = pl.pallas_call(
        _ssim_kernel,
        out_shape=jax.ShapeDtypeStruct((num_blocks, P, 1), jnp.float32),
        grid_spec=pltpu.PrefetchScalarGridSpec(
            num_scalar_prefetch=0,
            grid=(num_blocks,),
            in_specs=[
                pl.BlockSpec((H, H), lambda b: (0, 0)),        # A (grid-invariant)
                pl.BlockSpec((W, W), lambda b: (0, 0)),        # Bw (grid-invariant)
                pl.BlockSpec((P, H, W), lambda b: (b, 0, 0)),  # img1 planes
                pl.BlockSpec((P, H, W), lambda b: (b, 0, 0)),  # img2 planes
            ],
            out_specs=pl.BlockSpec((1, P, 1), lambda b: (b, 0, 0)),
        ),
        compiler_params=pltpu.CompilerParams(
            dimension_semantics=("parallel",),
            vmem_limit_bytes=vmem_limit),
    )(jnp.asarray(A), jnp.asarray(Bw), x1p, x2p)

    per_plane = out.reshape(NC_pad)[:NC]     # sum of ssim_map for each plane
    if size_average:
        return jnp.sum(per_plane) / (NC * H * W)
    # PyTorch: ssim_map.mean(1).mean(1).mean(1) == per-sample mean over C,H,W
    return jnp.sum(per_plane.reshape(N, C), axis=1) / (C * H * W)


class SSIM:
    """Mirror of the PyTorch SSIM module (forward pass)."""

    def __init__(self, window_size=11, size_average=True):
        self.window_size = window_size
        self.size_average = size_average

    def __call__(self, img1, img2):
        return ssim_pallas(img1, img2, self.window_size, self.size_average)


# ---------------------------- pure-JAX reference --------------------------- #
def ssim_reference(img1, img2, window_size=11, size_average=True):
    N, C, H, W = img1.shape
    pad = window_size // 2
    w1d = _gaussian_1d(window_size)
    w2d = jnp.asarray(np.outer(w1d, w1d).astype(np.float32))
    win = jnp.tile(w2d[None, None], (C, 1, 1, 1))  # (C,1,ws,ws), OIHW

    def conv(x):
        return jax.lax.conv_general_dilated(
            x, win, window_strides=(1, 1),
            padding=((pad, pad), (pad, pad)),
            feature_group_count=C,
            dimension_numbers=("NCHW", "OIHW", "NCHW"))

    mu1, mu2 = conv(img1), conv(img2)
    mu1_sq, mu2_sq, mu1_mu2 = mu1 * mu1, mu2 * mu2, mu1 * mu2
    sigma1_sq = conv(img1 * img1) - mu1_sq
    sigma2_sq = conv(img2 * img2) - mu2_sq
    sigma12 = conv(img1 * img2) - mu1_mu2
    C1, C2 = 0.01 ** 2, 0.03 ** 2
    ssim_map = ((2 * mu1_mu2 + C1) * (2 * sigma12 + C2) /
                ((mu1_sq + mu2_sq + C1) * (sigma1_sq + sigma2_sq + C2)))
    if size_average:
        return jnp.mean(ssim_map)
    return jnp.mean(ssim_map, axis=(1, 2, 3))


# ----------------------------------- main ---------------------------------- #
if __name__ == "__main__":
    key = jax.random.PRNGKey(0)
    k1, k2 = jax.random.split(key)

    # Case 1: module-default small shape (NC=8 -> P=4, two parallel blocks).
    img1 = jax.random.uniform(k1, (2, 4, 16, 16), dtype=jnp.float32)
    img2 = jax.random.uniform(k2, (2, 4, 16, 16), dtype=jnp.float32)
    ssim = SSIM(window_size=11, size_average=True)
    out = ssim(img1, img2)
    jax.block_until_ready(out)
    ref = ssim_reference(img1, img2, 11, True)
    assert np.allclose(np.asarray(out), np.asarray(ref), rtol=1e-3, atol=1e-5), (
        float(out), float(ref))

    # Case 2: many channels -> larger P, still two balanced blocks.
    k3, k4 = jax.random.split(k2)
    a = jax.random.uniform(k3, (2, 40, 16, 16), dtype=jnp.float32)
    b = jax.random.uniform(k4, (2, 40, 16, 16), dtype=jnp.float32)
    out2 = ssim_pallas(a, b, 11, True)
    jax.block_until_ready(out2)
    ref2 = ssim_reference(a, b, 11, True)
    assert np.allclose(np.asarray(out2), np.asarray(ref2), rtol=1e-3, atol=1e-5), (
        float(out2), float(ref2))

    # Case 3: odd channel count (exercises zero-padding of planes) and the
    # size_average=False (per-sample) branch.
    k5, k6 = jax.random.split(k4)
    c = jax.random.uniform(k5, (1, 3, 16, 16), dtype=jnp.float32)
    d = jax.random.uniform(k6, (1, 3, 16, 16), dtype=jnp.float32)
    out3 = ssim_pallas(c, d, 11, False)
    jax.block_until_ready(out3)
    ref3 = ssim_reference(c, d, 11, False)
    assert np.allclose(np.asarray(out3), np.asarray(ref3), rtol=1e-3, atol=1e-5), (
        np.asarray(out3), np.asarray(ref3))

    print("KERNEL_OK")
</pallas_src>

<mosaic_0001>
module attributes {stable_mosaic.version = 11 : i64} {
  func.func @_ssim_kernel(%arg0: i32, %arg1: memref<16x16xf32, #tpu.memory_space<vmem>>, %arg2: memref<16x16xf32, #tpu.memory_space<vmem>>, %arg3: memref<4x16x16xf32, #tpu.memory_space<vmem>>, %arg4: memref<4x16x16xf32, #tpu.memory_space<vmem>>, %arg5: memref<1x4x1xf32, #tpu.memory_space<vmem>>) attributes {dimension_semantics = [#tpu.dimension_semantics<parallel>], iteration_bounds = array<i64: 2>, scalar_prefetch = 0 : i64, scratch_operands = 0 : i64, tpu.core_type = #tpu.core_type<tc>, window_params = [{pipeline_mode = #tpu.pipeline_mode<synchronous>, transform_indices = @transform_0, window_bounds = array<i64: 16, 16>}, {pipeline_mode = #tpu.pipeline_mode<synchronous>, transform_indices = @transform_1, window_bounds = array<i64: 16, 16>}, {transform_indices = @transform_2, window_bounds = array<i64: 4, 16, 16>}, {transform_indices = @transform_3, window_bounds = array<i64: 4, 16, 16>}, {transform_indices = @transform_4, window_bounds = array<i64: 1, 4, 1>}]} {
    %c0 = arith.constant 0 : index
    %c0_0 = arith.constant 0 : index
    %0 = vector.load %arg1[%c0, %c0_0] : memref<16x16xf32, #tpu.memory_space<vmem>>, vector<16x16xf32>
    %c0_1 = arith.constant 0 : index
    %c0_2 = arith.constant 0 : index
    %1 = vector.load %arg2[%c0_1, %c0_2] : memref<16x16xf32, #tpu.memory_space<vmem>>, vector<16x16xf32>
    %c0_3 = arith.constant 0 : index
    %c0_4 = arith.constant 0 : index
    %c0_5 = arith.constant 0 : index
    %2 = vector.load %arg3[%c0_3, %c0_4, %c0_5] : memref<4x16x16xf32, #tpu.memory_space<vmem>>, vector<4x16x16xf32>
    %c0_6 = arith.constant 0 : index
    %c0_7 = arith.constant 0 : index
    %c0_8 = arith.constant 0 : index
    %3 = vector.load %arg4[%c0_6, %c0_7, %c0_8] : memref<4x16x16xf32, #tpu.memory_space<vmem>>, vector<4x16x16xf32>
    %4 = vector.shape_cast %0 : vector<16x16xf32> to vector<1x16x16xf32>
    %5 = vector.shape_cast %4 : vector<1x16x16xf32> to vector<1x16x16xf32>
    %6 = vector.broadcast %5 : vector<1x16x16xf32> to vector<4x16x16xf32>
    %7 = vector.shape_cast %2 : vector<4x16x16xf32> to vector<64x16xf32>
    %cst = arith.constant dense<0.000000e+00> : vector<64x16xf32>
    %8 = tpu.matmul %7, %1, %cst {dimension_numbers = #tpu.dot_dimension_numbers<[1], [0], [0], [1], [0, 0, 1, 1], [], []>} : vector<64x16xf32>, vector<16x16xf32>, vector<64x16xf32> -> vector<64x16xf32>
    %9 = vector.shape_cast %8 : vector<64x16xf32> to vector<4x16x16xf32>
    "tpu.trace_start"() <{level = 10 : i32, message = "puh,phw->puw"}> : () -> ()
    %cst_9 = arith.constant dense<0.000000e+00> : vector<4x16x16xf32>
    %10 = tpu.matmul %6, %9, %cst_9 {dimension_numbers = #tpu.dot_dimension_numbers<[2], [1], [1], [2], [0, 0, 0, 1, 1, 2], [0], [0]>} : vector<4x16x16xf32>, vector<4x16x16xf32>, vector<4x16x16xf32> -> vector<4x16x16xf32>
    "tpu.trace_stop"() : () -> ()
    %11 = vector.shape_cast %3 : vector<4x16x16xf32> to vector<64x16xf32>
    %cst_10 = arith.constant dense<0.000000e+00> : vector<64x16xf32>
    %12 = tpu.matmul %11, %1, %cst_10 {dimension_numbers = #tpu.dot_dimension_numbers<[1], [0], [0], [1], [0, 0, 1, 1], [], []>} : vector<64x16xf32>, vector<16x16xf32>, vector<64x16xf32> -> vector<64x16xf32>
    %13 = vector.shape_cast %12 : vector<64x16xf32> to vector<4x16x16xf32>
    "tpu.trace_start"() <{level = 10 : i32, message = "puh,phw->puw"}> : () -> ()
    %cst_11 = arith.constant dense<0.000000e+00> : vector<4x16x16xf32>
    %14 = tpu.matmul %6, %13, %cst_11 {dimension_numbers = #tpu.dot_dimension_numbers<[2], [1], [1], [2], [0, 0, 0, 1, 1, 2], [0], [0]>} : vector<4x16x16xf32>, vector<4x16x16xf32>, vector<4x16x16xf32> -> vector<4x16x16xf32>
    "tpu.trace_stop"() : () -> ()
    %15 = arith.mulf %2, %2 : vector<4x16x16xf32>
    %16 = vector.shape_cast %15 : vector<4x16x16xf32> to vector<64x16xf32>
    %cst_12 = arith.constant dense<0.000000e+00> : vector<64x16xf32>
    %17 = tpu.matmul %16, %1, %cst_12 {dimension_numbers = #tpu.dot_dimension_numbers<[1], [0], [0], [1], [0, 0, 1, 1], [], []>} : vector<64x16xf32>, vector<16x16xf32>, vector<64x16xf32> -> vector<64x16xf32>
    %18 = vector.shape_cast %17 : vector<64x16xf32> to vector<4x16x16xf32>
    "tpu.trace_start"() <{level = 10 : i32, message = "puh,phw->puw"}> : () -> ()
    %cst_13 = arith.constant dense<0.000000e+00> : vector<4x16x16xf32>
    %19 = tpu.matmul %6, %18, %cst_13 {dimension_numbers = #tpu.dot_dimension_numbers<[2], [1], [1], [2], [0, 0, 0, 1, 1, 2], [0], [0]>} : vector<4x16x16xf32>, vector<4x16x16xf32>, vector<4x16x16xf32> -> vector<4x16x16xf32>
    "tpu.trace_stop"() : () -> ()
    %20 = arith.mulf %3, %3 : vector<4x16x16xf32>
    %21 = vector.shape_cast %20 : vector<4x16x16xf32> to vector<64x16xf32>
    %cst_14 = arith.constant dense<0.000000e+00> : vector<64x16xf32>
    %22 = tpu.matmul %21, %1, %cst_14 {dimension_numbers = #tpu.dot_dimension_numbers<[1], [0], [0], [1], [0, 0, 1, 1], [], []>} : vector<64x16xf32>, vector<16x16xf32>, vector<64x16xf32> -> vector<64x16xf32>
    %23 = vector.shape_cast %22 : vector<64x16xf32> to vector<4x16x16xf32>
    "tpu.trace_start"() <{level = 10 : i32, message = "puh,phw->puw"}> : () -> ()
    %cst_15 = arith.constant dense<0.000000e+00> : vector<4x16x16xf32>
    %24 = tpu.matmul %6, %23, %cst_15 {dimension_numbers = #tpu.dot_dimension_numbers<[2], [1], [1], [2], [0, 0, 0, 1, 1, 2], [0], [0]>} : vector<4x16x16xf32>, vector<4x16x16xf32>, vector<4x16x16xf32> -> vector<4x16x16xf32>
    "tpu.trace_stop"() : () -> ()
    %25 = arith.mulf %2, %3 : vector<4x16x16xf32>
    %26 = vector.shape_cast %25 : vector<4x16x16xf32> to vector<64x16xf32>
    %cst_16 = arith.constant dense<0.000000e+00> : vector<64x16xf32>
    %27 = tpu.matmul %26, %1, %cst_16 {dimension_numbers = #tpu.dot_dimension_numbers<[1], [0], [0], [1], [0, 0, 1, 1], [], []>} : vector<64x16xf32>, vector<16x16xf32>, vector<64x16xf32> -> vector<64x16xf32>
    %28 = vector.shape_cast %27 : vector<64x16xf32> to vector<4x16x16xf32>
    "tpu.trace_start"() <{level = 10 : i32, message = "puh,phw->puw"}> : () -> ()
    %cst_17 = arith.constant dense<0.000000e+00> : vector<4x16x16xf32>
    %29 = tpu.matmul %6, %28, %cst_17 {dimension_numbers = #tpu.dot_dimension_numbers<[2], [1], [1], [2], [0, 0, 0, 1, 1, 2], [0], [0]>} : vector<4x16x16xf32>, vector<4x16x16xf32>, vector<4x16x16xf32> -> vector<4x16x16xf32>
    "tpu.trace_stop"() : () -> ()
    %30 = arith.mulf %10, %10 : vector<4x16x16xf32>
    %31 = arith.mulf %14, %14 : vector<4x16x16xf32>
    %32 = arith.mulf %10, %14 : vector<4x16x16xf32>
    %33 = arith.subf %19, %30 : vector<4x16x16xf32>
    %34 = arith.subf %24, %31 : vector<4x16x16xf32>
    %35 = arith.subf %29, %32 : vector<4x16x16xf32>
    %cst_18 = arith.constant 2.000000e+00 : f32
    %36 = vector.broadcast %cst_18 : f32 to vector<4x16x16xf32>
    %37 = arith.mulf %36, %32 : vector<4x16x16xf32>
    %cst_19 = arith.constant 9.99999974E-5 : f32
    %38 = vector.broadcast %cst_19 : f32 to vector<4x16x16xf32>
    %39 = arith.addf %37, %38 : vector<4x16x16xf32>
    %cst_20 = arith.constant 2.000000e+00 : f32
    %40 = vector.broadcast %cst_20 : f32 to vector<4x16x16xf32>
    %41 = arith.mulf %40, %35 : vector<4x16x16xf32>
    %cst_21 = arith.constant 8.99999984E-4 : f32
    %42 = vector.broadcast %cst_21 : f32 to vector<4x16x16xf32>
    %43 = arith.addf %41, %42 : vector<4x16x16xf32>
    %44 = arith.mulf %39, %43 : vector<4x16x16xf32>
    %45 = arith.addf %30, %31 : vector<4x16x16xf32>
    %cst_22 = arith.constant 9.99999974E-5 : f32
    %46 = vector.broadcast %cst_22 : f32 to vector<4x16x16xf32>
    %47 = arith.addf %45, %46 : vector<4x16x16xf32>
    %48 = arith.addf %33, %34 : vector<4x16x16xf32>
    %cst_23 = arith.constant 8.99999984E-4 : f32
    %49 = vector.broadcast %cst_23 : f32 to vector<4x16x16xf32>
    %50 = arith.addf %48, %49 : vector<4x16x16xf32>
    %51 = arith.mulf %47, %50 : vector<4x16x16xf32>
    %52 = tpu.reciprocal %51 : vector<4x16x16xf32> -> vector<4x16x16xf32>
    %53 = arith.mulf %44, %52 : vector<4x16x16xf32>
    %cst_24 = arith.constant dense<0.000000e+00> : vector<4x16xf32>
    %54 = vector.multi_reduction <add>, %53, %cst_24 [2] : vector<4x16x16xf32> to vector<4x16xf32>
    %cst_25 = arith.constant dense<0.000000e+00> : vector<4xf32>
    %55 = vector.multi_reduction <add>, %54, %cst_25 [1] : vector<4x16xf32> to vector<4xf32>
    %56 = vector.shape_cast %55 : vector<4xf32> to vector<4x1xf32>
    %c0_26 = arith.constant 0 : index
    %c0_27 = arith.constant 0 : index
    %c0_28 = arith.constant 0 : index
    %57 = vector.load %arg5[%c0_26, %c0_27, %c0_28] : memref<1x4x1xf32, #tpu.memory_space<vmem>>, vector<1x4x1xf32>
    %58 = vector.shape_cast %57 : vector<1x4x1xf32> to vector<4x1xf32>
    %59 = vector.shape_cast %56 : vector<4x1xf32> to vector<1x4x1xf32>
    tpu.vector_store %arg5[%c0_26, %c0_27, %c0_28], %59 {strides = array<i32>} : memref<1x4x1xf32, #tpu.memory_space<vmem>>, vector<1x4x1xf32>,
    return
  }
  func.func @transform_0(%arg0: i32) -> (i32, i32) {
    %c0_i32 = arith.constant 0 : i32
    %c0_i32_0 = arith.constant 0 : i32
    %c0_i32_1 = arith.constant 0 : i32
    return %c0_i32, %c0_i32_0 : i32, i32
  }
  func.func @transform_1(%arg0: i32) -> (i32, i32) {
    %c0_i32 = arith.constant 0 : i32
    %c0_i32_0 = arith.constant 0 : i32
    %c0_i32_1 = arith.constant 0 : i32
    return %c0_i32, %c0_i32_0 : i32, i32
  }
  func.func @transform_2(%arg0: i32) -> (i32, i32, i32) {
    %c0_i32 = arith.constant 0 : i32
    %c0_i32_0 = arith.constant 0 : i32
    %c0_i32_1 = arith.constant 0 : i32
    return %arg0, %c0_i32, %c0_i32_0 : i32, i32, i32
  }
  func.func @transform_3(%arg0: i32) -> (i32, i32, i32) {
    %c0_i32 = arith.constant 0 : i32
    %c0_i32_0 = arith.constant 0 : i32
    %c0_i32_1 = arith.constant 0 : i32
    return %arg0, %c0_i32, %c0_i32_0 : i32, i32, i32
  }
  func.func @transform_4(%arg0: i32) -> (i32, i32, i32) {
    %c0_i32 = arith.constant 0 : i32
    %c0_i32_0 = arith.constant 0 : i32
    %c0_i32_1 = arith.constant 0 : i32
    return %arg0, %c0_i32, %c0_i32_0 : i32, i32, i32
  }
}

</mosaic_0001>

<bundles_post_ra>
// kernel: tpu_custom_call.1
= control target key start
LH: loop header
LB: loop body
LE: loop exit
PB: predicated region body
PF: predicated region fallthrough
CT: control target
= control target key end

     0   :  { %s2659_s0 = inlined_call_operand.hbm [shape: f32[16,16], index: 0, kind: input, shape index: {}]   ;;  %s2660_s1 = inlined_call_operand.hbm [shape: f32[16,16], index: 1, kind: input, shape index: {}]   ;;  %s2661_s2 = inlined_call_operand.hbm [shape: f32[8,16,16], index: 2, kind: input, shape index: {}]   ;;  %s2662_s3 = inlined_call_operand.hbm [shape: f32[8,16,16], index: 3, kind: input, shape index: {}]   ;;  %s2663_s4 = inlined_call_operand.vmem [shape: f32[2,4,1], index: 4, kind: output, shape index: {}]  }
   0x1   :  { %2667 = sst [smem:[#allocation11_spill]] %s2659_s0 }
   0x2   :  { %9 = vsyncpa [#allocation3], 0 }
   0x3   :  { %10 = vsyncpa [#allocation5], 0  ;;  %s1922_s15 = smov 0   ;;  %s1924_s16 = smov 0  }
   0x4   :  { %s1926_s17 = smov 0   ;;  %s1928_s18 = smov 0  }
   0x5 LB: > { %s1941_s19 = sadd.s32 4294967295, %s1891_s18   ;;  %p78_p0 = scmp.ne.s32.totalorder %s1883_s16, %s1879_s15  ;;  %s1891_s18 = sphi %s1928_s18, %s2692_s18   ;;  %s1887_s17 = sphi %s1926_s17, %s2691_s17   ;;  %s1883_s16 = sphi %s1924_s16, %s2690_s16   ;;  %s1879_s15 = sphi %s1922_s15, %s2689_s15  }
   0x6   : > { %p79_p1 = scmp.eq.s32.totalorder %s1941_s19, 0  ;;  %p1542_p2 = scmp.ge.s32.totalorder %s1891_s18, 1 }
   0x7   : > { %p141_p3 = scmp.lt.s32.totalorder %s1891_s18, 3  ;;  %s2669_s0 = sld [smem:[#allocation11_spill]] }
   0x8   : > { %p1949_p4 = por %p79_p1, %p78_p0  ;;  %s1893_s25 = smov [#allocation2]  }
   0x9   : > { %p1956_p5 = pnand %p1542_p2, %p141_p3  ;;  %s154_s26 = sshll.u32 %s1893_s25, 4  ;;  %s155_s26 = int_to_ptr.vmem [resolvable:$true] %s154_s26 }
   0xa   : > { %s1969_s28 = sadd.s32 1, %s1891_s18   ;;  %s2665_s29 = smov 128  }
   0xb   : > { %p1658_p6 = pneg %p1956_p5  ;;  %s1895_s30 = smov 8  }
   0xc   : > { %s62_s5 = ssub.s32 %s1891_s18, %s1969_s28  ;;  %s65_s6 = sadd.s32 1, %s1887_s17 }
   0xd   : > { %s152_s23 = sshll.u32 %s2669_s0, 4  ;;  %p1964_p7 = pnand %p1658_p6, %p79_p1  ;;  %s153_s23 = int_to_ptr.hbm [resolvable:$true] %s152_s23 }
   0xe   : > { %p63_p8 = scmp.eq.s32.totalorder %s62_s5, 0  ;;  %p72_p9 = scmp.ne.s32.totalorder %s1887_s17, %s1883_s16 }
   0xf   : > { %1661 = dma.hbm_to_vmem [thread:$0]  (!%p1964_p7), %s153_s23, 256, %s155_s26, [#allocation3], %s2665_s29, %s2665_s29, %s1895_s30  }
  0x10   : > { %p73_p10 = scmp.eq.s32.totalorder %s1891_s18, 0  ;;  %p1674_p11 = scmp.lt.s32.totalorder %s1891_s18, 2 }
  0x11   : > { %s1984_s7 = scalar_select %p63_p8, %s1887_s17, %s65_s6  }
  0x12   : > { %p74_p12 = por %p73_p10, %p72_p9  ;;  %s182_s8 = sand.u32 1, %s1891_s18  }
  0x13   : > { %s184_s9 = sand.u32 1, %s1887_s17   ;;  %s2664_s11 = sshll.u32 %s1891_s18, 6 }
  0x14   : > { %s1988_s10 = sshll.u32 %s184_s9, 6  ;;  %s192_s14 = scalar_lea.hbm %s2661_s2, %s2664_s11 }
  0x15   : > { %s193_s15 = sshll.u32 %s192_s14, 4  ;;  %s186_s21 = scalar_lea.vmem [#allocation6], %s1988_s10  ;;  %s194_s15 = int_to_ptr.hbm [resolvable:$true] %s193_s15 }
  0x16   : > { %s195_s22 = sshll.u32 %s186_s21, 4  ;;  %p1999_p13 = pnand %p1674_p11, %p74_p12  ;;  %s196_s22 = int_to_ptr.vmem [resolvable:$true] %s195_s22 }
  0x17   : > { %s166_s5 = sshll.u32 %s2660_s1, 4  ;;  %s1896_s6 = smov [#allocation4]   ;;  %s167_s5 = int_to_ptr.hbm [resolvable:$true] %s166_s5 }
  0x18   : > { %s168_s9 = sshll.u32 %s1896_s6, 4  ;;  %s2006_s12 = scalar_lea.sflag [#allocation3], %s182_s8  ;;  %s169_s9 = int_to_ptr.vmem [resolvable:$true] %s168_s9 }
  0x19   : > { %s1759_s13 = sshra.s32 %s194_s15, 4  ;;  %p1763_p2 = pneg %p1999_p13  ;;  %s1760_s13 = int_to_ptr.hbm [resolvable:$true] %s1759_s13 }
  0x1a   : > { %s1761_s14 = scalar_lea.hbm %s1760_s13, 64  ;;  %s1766_s26 = scalar_lea.hbm %s2661_s2, 128 }
  0x1b   : > { %p1762_p0 = scmp.ne.s32.totalorder %s1760_s13, %s1761_s14  ;;  %p1767_p8 = scmp.lt.s32.totalorder %s1760_s13, %s2661_s2 }
  0x1c   : > { %p1768_p9 = scmp.lt.s32.totalorder %s1766_s26, %s1761_s14 }
  0x1d   : > { %p1764_p3 = pnand %p1763_p2, %p1762_p0 }
  0x1e   : > { %p1769_p10 = por %p1768_p9, %p1767_p8 }
  0x1f   : > { %p1765_p6 = pneg %p1764_p3 }
  0x21   : > { %p1770_p11 = pnand %p1769_p10, %p1765_p6 }
  0x23   : > { %1773 = shalt.err (!%p1770_p11)
}
  0x24   : > { %s2673_s8 = smov 128   ;;  %s2674_s29 = sshll.u32 %s1891_s18, 6 }
  0x25   : > { %1668 = dma.hbm_to_vmem [thread:$0]  (!%p1999_p13), %s194_s15, 1024, %s196_s22, %s2006_s12, %s2673_s8, %s2673_s8, %s1895_s30  }
  0x26   : > { %1664 = dma.hbm_to_vmem [thread:$0]  (!%p1964_p7), %s167_s5, 256, %s169_s9, [#allocation5], %s2673_s8, %s2673_s8, %s1895_s30  }
  0x27   : > { %s215_s13 = scalar_lea.hbm %s2662_s3, %s2674_s29  ;;  %s209_s14 = scalar_lea.vmem [#allocation7], %s1988_s10 }
  0x28   : > { %s218_s21 = sshll.u32 %s209_s14, 4  ;;  %s216_s25 = sshll.u32 %s215_s13, 4  ;;  %s219_s21 = int_to_ptr.vmem [resolvable:$true] %s218_s21  ;;  %s217_s25 = int_to_ptr.hbm [resolvable:$true] %s216_s25 }
  0x29   : > { %s1819_s26 = sshra.s32 %s217_s25, 4  ;;  %s1826_s18 = scalar_lea.hbm %s2662_s3, 128  ;;  %s1820_s26 = int_to_ptr.hbm [resolvable:$true] %s1819_s26 }
  0x2a   : > { %s1821_s0 = scalar_lea.hbm %s1820_s26, 64  ;;  %p1827_p7 = scmp.lt.s32.totalorder %s1820_s26, %s2662_s3 }
  0x2b   : > { %p1822_p12 = scmp.ne.s32.totalorder %s1820_s26, %s1821_s0  ;;  %p1828_p6 = scmp.lt.s32.totalorder %s1826_s18, %s1821_s0 }
  0x2d   : > { %p1824_p0 = pnand %p1822_p12, %p1763_p2  ;;  %p1829_p8 = por %p1828_p6, %p1827_p7 }
  0x2f   : > { %p1825_p3 = pneg %p1824_p0 }
  0x31   : > { %p1830_p9 = pnand %p1829_p8, %p1825_p3 }
  0x33   : > { %1833 = shalt.err (!%p1830_p9)
}
  0x34   : > { %1671 = dma.hbm_to_vmem [thread:$0]  (!%p1999_p13), %s217_s25, 1024, %s219_s21, %s2006_s12, %s2673_s8, %s2673_s8, %s1895_s30  }
  0x35   : > { %230 = sbr.rel (%p1956_p5) target bundleno = 1083 (0x43b), region = 36 }
  0x3a   : > { %1866 = dma.done.wait (%p79_p1), [#allocation3], 256  }
  0x3b   : > { %1868 = vsyncadd (%p79_p1), [#allocation3], 4294967040 }
  0x3c   : > { %1870 = dma.done.wait (%p79_p1), [#allocation5], 256  }
  0x3d   : > { %1872 = vsyncadd (%p79_p1), [#allocation5], 4294967040  ;;  %s242_s0 = sand.u32 1, %s1941_s19   ;;  %s244_s30 = sand.u32 1, %s1883_s16  }
  0x3e   : > { %s2063_s10 = sshll.u32 %s244_s30, 6  ;;  %s243_s24 = scalar_lea.sflag [#allocation3], %s242_s0 }
  0x3f   : > { %s2066_s23 = scalar_lea.vmem [#allocation6], %s2063_s10 }
  0x40   : > { %1874 = dma.done.wait (%p1949_p4), %s243_s24, 2048  }
  0x41   : > { %1876 = vsyncadd (%p1949_p4), %s243_s24, 4294965248  ;;  %v2072_v0 = vld [vmem:[#allocation4 + $0x8] sm:$0xff]  ;;  %v2074_v1 = vld [vmem:[#allocation4] sm:$0xff]  ;;  %vm312_vm0 = vcmask 130048   ;;  %s2139_s20 = scalar_lea.vmem [#allocation7], %s2063_s10  ;;  %p288_p1 = scmp.lt.s32.totalorder %s1941_s19, 1 }
  0x42   : > { %351 = vmatpush.msra.mxu0 %v2072_v0  ;;  %v2078_v2 = vld [vmem:[%s2066_s23] sm:$0xff]  ;;  %v2084_v3 = vld [vmem:[%s2066_s23 + $0x8] sm:$0xff]  ;;  %v2089_v4 = vld [vmem:[%s2066_s23 + $0x10] sm:$0xff] }
  0x43   : > { %v2094_v5 = vld [vmem:[%s2066_s23 + $0x18] sm:$0xff]  ;;  %v2099_v6 = vld [vmem:[%s2066_s23 + $0x20] sm:$0xff]  ;;  %v2104_v7 = vld [vmem:[%s2066_s23 + $0x28] sm:$0xff]  ;;  %v633_v39 = vmul.f32 %v2078_v2, %v2078_v2  ;;  %v634_v41 = vmul.f32 %v2084_v3, %v2084_v3  ;;  %v635_v43 = vmul.f32 %v2089_v4, %v2089_v4  ;;  %s2694_s19 = smov (!%p288_p1, %s1941_s19), 1 }
  0x44   : > { %352 = vmatpush.msra.mxu0 %v2074_v1  ;;  %v2108_v10 = vld [vmem:[#allocation2] sm:$0xff]  ;;  %v2112_v12 = vld [vmem:[#allocation2 + $0x8] sm:$0xff]  ;;  %v2119_v14 = vld [vmem:[%s2066_s23 + $0x30] sm:$0xff]  ;;  %v636_v45 = vmul.f32 %v2094_v5, %v2094_v5  ;;  %v637_v47 = vmul.f32 %v2099_v6, %v2099_v6  ;;  %v638_v49 = vmul.f32 %v2104_v7, %v2104_v7  ;;  %s1559_s9 = sshll.u32 %s2694_s19, 2 }
  0x45   : > { %1560 = vmatmul.msk.f32.vlgmr.msra.gmra.mxu0 %vm312_vm0, %v2078_v2  ;;  %v2126_v16 = vld [vmem:[%s2066_s23 + $0x38] sm:$0xff]  ;;  %v2142_v18 = vld [vmem:[%s2139_s20] sm:$0xff]  ;;  %v2147_v19 = vld [vmem:[%s2139_s20 + $0x8] sm:$0xff]  ;;  %v639_v51 = vmul.f32 %v2119_v14, %v2119_v14  ;;  %s291_s29 = scalar_lea.vmem %s2663_s4, %s1559_s9 }
  0x46   : > { %v2152_v20 = vld [vmem:[%s2139_s20 + $0x10] sm:$0xff]  ;;  %v2157_v21 = vld [vmem:[%s2139_s20 + $0x18] sm:$0xff]  ;;  %v2162_v22 = vld [vmem:[%s2139_s20 + $0x20] sm:$0xff]  ;;  %v798_v35 = vmul.f32 %v2142_v18, %v2142_v18  ;;  %v799_v40 = vmul.f32 %v2147_v19, %v2147_v19  ;;  %v640_v53 = vmul.f32 %v2126_v16, %v2126_v16  ;;  %v963_v54 = vmul.f32 %v2142_v18, %v2078_v2 }
  0x47   : > { %v2167_v23 = vld [vmem:[%s2139_s20 + $0x28] sm:$0xff]  ;;  %v2184_v32 = vld [vmem:[%s2139_s20 + $0x30] sm:$0xff]  ;;  %v2191_v34 = vld [vmem:[%s2139_s20 + $0x38] sm:$0xff]  ;;  %v800_v42 = vmul.f32 %v2152_v20, %v2152_v20  ;;  %v801_v44 = vmul.f32 %v2157_v21, %v2157_v21  ;;  %v802_v46 = vmul.f32 %v2162_v22, %v2162_v22  ;;  %v964_v55 = vmul.f32 %v2147_v19, %v2084_v3 }
  0x48   : > { %v803_v48 = vmul.f32 %v2167_v23, %v2167_v23  ;;  %v804_v50 = vmul.f32 %v2184_v32, %v2184_v32  ;;  %v805_v52 = vmul.f32 %v2191_v34, %v2191_v34  ;;  %v965_v56 = vmul.f32 %v2152_v20, %v2089_v4 }
  0x49   : > { %v966_v61 = vmul.f32 %v2157_v21, %v2094_v5 }
  0x4d   : > { %1561 = vmatmul.msk.f32.gmra.mxu0 %vm312_vm0, %v2084_v3 }
  0x55   : > { %1562 = vmatmul.msk.f32.gmra.mxu0 %vm312_vm0, %v2089_v4 }
  0x5d   : > { %1563 = vmatmul.msk.f32.gmra.mxu0 %vm312_vm0, %v2094_v5 }
  0x65   : > { %1564 = vmatmul.msk.f32.gmra.mxu0 %vm312_vm0, %v2099_v6 }
  0x6d   : > { %1565 = vmatmul.msk.f32.gmra.mxu0 %vm312_vm0, %v2104_v7 }
  0x75   : > { %1566 = vmatmul.msk.f32.gmra.mxu0 %vm312_vm0, %v2119_v14 }
  0x7d   : > { %1567 = vmatmul.msk.f32.gmra.mxu0 %vm312_vm0, %v2126_v16 }
  0xc2   : > { %v354_v8 = vpop.f32.mrf.mxu0 }
  0xca   : > { %v357_v9 = vpop.f32.mrf.mxu0 }
  0xcb   : > { %398 = vmatpush.msra.mxu1 %v357_v9 }
  0xcd   : > { %399 = vmatpush.msra.mxu1 %v354_v8  ;;  %v967_v8 = vmul.f32 %v2162_v22, %v2099_v6  ;;  %v969_v6 = vmul.f32 %v2184_v32, %v2119_v14 }
  0xce   : > { %1568 = vmatmul.msk.f32.vlgmr.msra.gmra.mxu1 %vm312_vm0, %v2108_v10 }
  0xd2   : > { %v360_v11 = vpop.f32.mrf.mxu0 }
  0xd6   : > { %1569 = vmatmul.msk.f32.gmra.mxu1 %vm312_vm0, %v2112_v12 }
  0xda   : > { %v363_v13 = vpop.f32.mrf.mxu0 }
  0xdb   : > { %421 = vmatpush.msra.mxu2 %v363_v13  ;;  %v968_v13 = vmul.f32 %v2167_v23, %v2104_v7 }
  0xdd   : > { %422 = vmatpush.msra.mxu2 %v360_v11 }
  0xde   : > { %1570 = vmatmul.msk.f32.vlgmr.msra.gmra.mxu2 %vm312_vm0, %v2108_v10 }
  0xe2   : > { %v366_v15 = vpop.f32.mrf.mxu0 }
  0xe6   : > { %1571 = vmatmul.msk.f32.gmra.mxu2 %vm312_vm0, %v2112_v12 }
  0xea   : > { %v369_v17 = vpop.f32.mrf.mxu0 }
  0xeb   : > { %444 = vmatpush.msrb.mxu2 %v369_v17  ;;  %v970_v17 = vmul.f32 %v2191_v34, %v2126_v16 }
  0xed   : > { %445 = vmatpush.msrb.mxu2 %v366_v15 }
  0xee   : > { %1572 = vmatmul.msk.f32.vlgmr.msrb.gmra.mxu2 %vm312_vm0, %v2108_v10 }
  0xef   : > { %514 = vmatpush.msra.mxu2 %v2072_v0 }
  0xf1   : > { %515 = vmatpush.msra.mxu2 %v2074_v1 }
  0xf2   : > { %v372_v24 = vpop.f32.mrf.mxu0 }
  0xf3   : > { %844 = vmatpush.msrb.mxu2 %v2072_v0 }
  0xf5   : > { %845 = vmatpush.msrb.mxu2 %v2074_v1 }
  0xf6   : > { %1573 = vmatmul.msk.f32.gmra.mxu2 %vm312_vm0, %v2112_v12 }
  0xfa   : > { %v375_v26 = vpop.f32.mrf.mxu0 }
  0xfb   : > { %467 = vmatpush.msrb.mxu1 %v375_v26 }
  0xfd   : > { %468 = vmatpush.msrb.mxu1 %v372_v24 }
  0xfe   : > { %1576 = vmatmul.msk.f32.vlgmr.msra.gmra.mxu2 %vm312_vm0, %v2142_v18  ;;  %1574 = vmatmul.msk.f32.vlgmr.msrb.gmra.mxu1 %vm312_vm0, %v2108_v10 }
 0x106   : > { %1577 = vmatmul.msk.f32.gmra.mxu2 %vm312_vm0, %v2147_v19  ;;  %1575 = vmatmul.msk.f32.gmra.mxu1 %vm312_vm0, %v2112_v12 }
 0x10e   : > { %1578 = vmatmul.msk.f32.gmra.mxu2 %vm312_vm0, %v2152_v20 }
 0x116   : > { %1579 = vmatmul.msk.f32.gmra.mxu2 %vm312_vm0, %v2157_v21 }
 0x11e   : > { %1580 = vmatmul.msk.f32.gmra.mxu2 %vm312_vm0, %v2162_v22 }
 0x126   : > { %1581 = vmatmul.msk.f32.gmra.mxu2 %vm312_vm0, %v2167_v23 }
 0x12e   : > { %1582 = vmatmul.msk.f32.gmra.mxu2 %vm312_vm0, %v2184_v32 }
 0x136   : > { %1583 = vmatmul.msk.f32.gmra.mxu2 %vm312_vm0, %v2191_v34 }
 0x13e   : > { %1608 = vmatmul.msk.f32.vlgmr.msrb.gmra.mxu2 %vm312_vm0, %v798_v35 }
 0x146   : > { %1609 = vmatmul.msk.f32.gmra.mxu2 %vm312_vm0, %v799_v40 }
 0x14b   : > { %v401_v57 = vpop.f32.mrf.mxu1 }
 0x14c   : > { %v2266_v58 = vmul.f32 %v401_v57, %v401_v57 }
 0x14e   : > { %1610 = vmatmul.msk.f32.gmra.mxu2 %vm312_vm0, %v800_v42 }
 0x156   : > { %1611 = vmatmul.msk.f32.gmra.mxu2 %vm312_vm0, %v801_v44 }
 0x15e   : > { %1612 = vmatmul.msk.f32.gmra.mxu2 %vm312_vm0, %v802_v46 }
 0x161   : > { %v2171_v25 = vpop.f32.mrf.mxu2 }
 0x166   : > { %1613 = vmatmul.msk.f32.gmra.mxu2 %vm312_vm0, %v803_v48 }
 0x169   : > { %v2175_v27 = vpop.f32.mrf.mxu2 }
 0x16e   : > { %1614 = vmatmul.msk.f32.gmra.mxu2 %vm312_vm0, %v804_v50 }
 0x171   : > { %v2179_v28 = vpop.f32.mrf.mxu2 }
 0x176   : > { %1615 = vmatmul.msk.f32.gmra.mxu2 %vm312_vm0, %v805_v52 }
 0x179   : > { %v2181_v29 = vpop.f32.mrf.mxu2 }
 0x181   : > { %v517_v30 = vpop.f32.mrf.mxu2 }
 0x189   : > { %v520_v31 = vpop.f32.mrf.mxu2 }
 0x18a   : > { %555 = vmatpush.msra.mxu3 %v520_v31 }
 0x18c   : > { %556 = vmatpush.msra.mxu3 %v517_v30 }
 0x18d   : > { %1584 = vmatmul.msk.f32.vlgmr.msra.gmra.mxu3 %vm312_vm0, %v2108_v10 }
 0x191   : > { %v523_v33 = vpop.f32.mrf.mxu2 }
 0x195   : > { %1585 = vmatmul.msk.f32.gmra.mxu3 %vm312_vm0, %v2112_v12 }
 0x199   : > { %v526_v36 = vpop.f32.mrf.mxu2 }
 0x19a   : > { %578 = vmatpush.msra.mxu1 %v526_v36 }
 0x19c   : > { %579 = vmatpush.msra.mxu1 %v523_v33 }
 0x19d   : > { %1586 = vmatmul.msk.f32.vlgmr.msra.gmra.mxu1 %vm312_vm0, %v2108_v10 }
 0x1a1   : > { %v529_v37 = vpop.f32.mrf.mxu2 }
 0x1a5   : > { %1587 = vmatmul.msk.f32.gmra.mxu1 %vm312_vm0, %v2112_v12 }
 0x1a9   : > { %v532_v38 = vpop.f32.mrf.mxu2 }
 0x1aa   : > { %601 = vmatpush.msrb.mxu3 %v532_v38 }
 0x1ac   : > { %602 = vmatpush.msrb.mxu3 %v529_v37 }
 0x1ad   : > { %1588 = vmatmul.msk.f32.vlgmr.msrb.gmra.mxu3 %vm312_vm0, %v2108_v10 }
 0x1ae   : > { %679 = vmatpush.msra.mxu3 %v2072_v0 }
 0x1b0   : > { %680 = vmatpush.msra.mxu3 %v2074_v1 }
 0x1b1   : > { %v535_v60 = vpop.f32.mrf.mxu2 }
 0x1b2   : > { %1009 = vmatpush.msrb.mxu3 %v2072_v0 }
 0x1b4   : > { %1010 = vmatpush.msrb.mxu3 %v2074_v1  ;;  %v404_v1 = vpop.f32.mrf.mxu1 }
 0x1b5   : > { %1589 = vmatmul.msk.f32.gmra.mxu3 %vm312_vm0, %v2112_v12  ;;  %v2279_v2 = vmul.f32 %v404_v1, %v404_v1 }
 0x1b9   : > { %v538_v4 = vpop.f32.mrf.mxu2 }
 0x1ba   : > { %624 = vmatpush.msrb.mxu1 %v538_v4 }
 0x1bc   : > { %625 = vmatpush.msrb.mxu1 %v535_v60  ;;  %v2349_v42 = vpop.f32.mrf.mxu1 }
 0x1bd   : > { %1592 = vmatmul.msk.f32.vlgmr.msra.gmra.mxu3 %vm312_vm0, %v633_v39  ;;  %1590 = vmatmul.msk.f32.vlgmr.msrb.gmra.mxu1 %vm312_vm0, %v2108_v10 }
 0x1c1   : > { %v847_v18 = vpop.f32.mrf.mxu2 }
 0x1c5   : > { %1593 = vmatmul.msk.f32.gmra.mxu3 %vm312_vm0, %v634_v41  ;;  %1591 = vmatmul.msk.f32.gmra.mxu1 %vm312_vm0, %v2112_v12 }
 0x1c9   : > { %v850_v20 = vpop.f32.mrf.mxu2 }
 0x1cd   : > { %1594 = vmatmul.msk.f32.gmra.mxu3 %vm312_vm0, %v635_v43 }
 0x1d1   : > { %v853_v22 = vpop.f32.mrf.mxu2 }
 0x1d5   : > { %1595 = vmatmul.msk.f32.gmra.mxu3 %vm312_vm0, %v636_v45  ;;  %v2355_v45 = vpop.f32.mrf.mxu1 }
 0x1d9   : > { %v856_v23 = vpop.f32.mrf.mxu2 }
 0x1dd   : > { %1596 = vmatmul.msk.f32.gmra.mxu3 %vm312_vm0, %v637_v47 }
 0x1e1   : > { %v859_v24 = vpop.f32.mrf.mxu2 }
 0x1e5   : > { %1597 = vmatmul.msk.f32.gmra.mxu3 %vm312_vm0, %v638_v49 }
 0x1e9   : > { %v862_v31 = vpop.f32.mrf.mxu2 }
 0x1ed   : > { %1598 = vmatmul.msk.f32.gmra.mxu3 %vm312_vm0, %v639_v51 }
 0x1f1   : > { %v865_v33 = vpop.f32.mrf.mxu2 }
 0x1f5   : > { %1599 = vmatmul.msk.f32.gmra.mxu3 %vm312_vm0, %v640_v53 }
 0x1f9   : > { %v868_v35 = vpop.f32.mrf.mxu2 }
 0x1fd   : > { %1624 = vmatmul.msk.f32.vlgmr.msrb.gmra.mxu3 %vm312_vm0, %v963_v54 }
 0x205   : > { %1625 = vmatmul.msk.f32.gmra.mxu3 %vm312_vm0, %v964_v55 }
 0x20d   : > { %1626 = vmatmul.msk.f32.gmra.mxu3 %vm312_vm0, %v965_v56 }
 0x210   : > { %v558_v59 = vpop.f32.mrf.mxu3 }
 0x211   : > { %v2270_v62 = vmul.f32 %v558_v59, %v558_v59  ;;  %v2272_v63 = vmul.f32 %v558_v59, %v401_v57 }
 0x213   : > { %v2276_v0 = vadd.f32 %v2270_v62, %v2266_v58 }
 0x215   : > { %1627 = vmatmul.msk.f32.gmra.mxu3 %vm312_vm0, %v966_v61  ;;  %v1224_v60 = vadd.f32 0.0001, %v2276_v0  ;;  %v1130_v0 = vmul.f32 %v2171_v25, %v2171_v25 }
 0x218   : > { %v561_v3 = vpop.f32.mrf.mxu3 }
 0x219   : > { %v2283_v9 = vmul.f32 %v561_v3, %v561_v3  ;;  %v2285_v5 = vmul.f32 %v561_v3, %v404_v1 }
 0x21a   : > { %v581_v46 = vpop.f32.mrf.mxu1 }
 0x21b   : > { %v2289_v11 = vadd.f32 %v2283_v9, %v2279_v2 }
 0x21d   : > { %1628 = vmatmul.msk.f32.gmra.mxu3 %vm312_vm0, %v967_v8 }
 0x222   : > { %v2361_v47 = vpop.f32.mrf.mxu1 }
 0x225   : > { %1629 = vmatmul.msk.f32.gmra.mxu3 %vm312_vm0, %v968_v13 }
 0x22d   : > { %1630 = vmatmul.msk.f32.gmra.mxu3 %vm312_vm0, %v969_v6 }
 0x230   : > { %v2302_v15 = vpop.f32.mrf.mxu3 }
 0x235   : > { %1631 = vmatmul.msk.f32.gmra.mxu3 %vm312_vm0, %v970_v17  ;;  %v1138_v17 = vmul.f32 %v581_v46, %v581_v46 }
 0x238   : > { %v2307_v19 = vpop.f32.mrf.mxu3 }
 0x23a   : > { %v2363_v48 = vpop.f32.mrf.mxu1 }
 0x240   : > { %v682_v7 = vpop.f32.mrf.mxu3 }
 0x242   : > { %v2365_v50 = vpop.f32.mrf.mxu1 }
 0x248   : > { %v685_v21 = vpop.f32.mrf.mxu3 }
 0x249   : > { %720 = vmatpush.msrb.mxu0 %v685_v21 }
 0x24b   : > { %721 = vmatpush.msrb.mxu0 %v682_v7  ;;  %v1132_v7 = vmul.f32 %v2179_v28, %v2179_v28 }
 0x24c   : > { %1600 = vmatmul.msk.f32.vlgmr.msrb.gmra.mxu0 %vm312_vm0, %v2108_v10 }
 0x250   : > { %v688_v14 = vpop.f32.mrf.mxu3 }
 0x254   : > { %1601 = vmatmul.msk.f32.gmra.mxu0 %vm312_vm0, %v2112_v12 }
 0x258   : > { %v691_v16 = vpop.f32.mrf.mxu3 }
 0x259   : > { %743 = vmatpush.msra.mxu1 %v691_v16 }
 0x25b   : > { %744 = vmatpush.msra.mxu1 %v688_v14 }
 0x25c   : > { %1602 = vmatmul.msk.f32.vlgmr.msra.gmra.mxu1 %vm312_vm0, %v2108_v10 }
 0x260   : > { %v694_v26 = vpop.f32.mrf.mxu3 }
 0x264   : > { %1603 = vmatmul.msk.f32.gmra.mxu1 %vm312_vm0, %v2112_v12 }
 0x268   : > { %v697_v30 = vpop.f32.mrf.mxu3 }
 0x269   : > { %766 = vmatpush.msra.mxu0 %v697_v30 }
 0x26b   : > { %767 = vmatpush.msra.mxu0 %v694_v26  ;;  %v1139_v26 = vmul.f32 %v2361_v47, %v2361_v47 }
 0x26c   : > { %1604 = vmatmul.msk.f32.vlgmr.msra.gmra.mxu0 %vm312_vm0, %v2108_v10 }
 0x26d   : > { %885 = vmatpush.msrb.mxu0 %v850_v20 }
 0x26f   : > { %886 = vmatpush.msrb.mxu0 %v847_v18  ;;  %v1140_v18 = vmul.f32 %v2302_v15, %v2302_v15 }
 0x270   : > { %v700_v32 = vpop.f32.mrf.mxu3 }
 0x271   : > { %931 = vmatpush.msra.mxu0 %v862_v31 }
 0x273   : > { %932 = vmatpush.msra.mxu0 %v859_v24  ;;  %v1220_v24 = vadd.f32 %v1140_v18, %v1132_v7 }
 0x274   : > { %1605 = vmatmul.msk.f32.gmra.mxu0 %vm312_vm0, %v2112_v12 }
 0x278   : > { %v703_v34 = vpop.f32.mrf.mxu3 }
 0x279   : > { %789 = vmatpush.msrb.mxu1 %v703_v34 }
 0x27b   : > { %790 = vmatpush.msrb.mxu1 %v700_v32  ;;  %v1131_v32 = vmul.f32 %v2175_v27, %v2175_v27 }
 0x27c   : > { %1606 = vmatmul.msk.f32.vlgmr.msrb.gmra.mxu1 %vm312_vm0, %v2108_v10  ;;  %1616 = vmatmul.msk.f32.vlgmr.msrb.gmra.mxu0 %vm312_vm0, %v2108_v10 }
 0x27d   : > { %908 = vmatpush.msra.mxu1 %v856_v23 }
 0x27f   : > { %909 = vmatpush.msra.mxu1 %v853_v22 }
 0x280   : > { %v1012_v36 = vpop.f32.mrf.mxu3 }
 0x281   : > { %954 = vmatpush.msrb.mxu1 %v868_v35 }
 0x283   : > { %955 = vmatpush.msrb.mxu1 %v865_v33  ;;  %v1141_v33 = vmul.f32 %v2307_v19, %v2307_v19 }
 0x284   : > { %1607 = vmatmul.msk.f32.gmra.mxu1 %vm312_vm0, %v2112_v12  ;;  %1617 = vmatmul.msk.f32.gmra.mxu0 %vm312_vm0, %v2112_v12 }
 0x288   : > { %v1015_v37 = vpop.f32.mrf.mxu3 }
 0x289   : > { %1050 = vmatpush.msrb.mxu0 %v1015_v37 }
 0x28b   : > { %1051 = vmatpush.msrb.mxu0 %v1012_v36 }
 0x28c   : > { %1618 = vmatmul.msk.f32.vlgmr.msra.gmra.mxu1 %vm312_vm0, %v2108_v10  ;;  %1620 = vmatmul.msk.f32.vlgmr.msra.gmra.mxu0 %vm312_vm0, %v2108_v10 }
 0x290   : > { %v1018_v38 = vpop.f32.mrf.mxu3 }
 0x294   : > { %1619 = vmatmul.msk.f32.gmra.mxu1 %vm312_vm0, %v2112_v12  ;;  %1621 = vmatmul.msk.f32.gmra.mxu0 %vm312_vm0, %v2112_v12 }
 0x298   : > { %v1021_v39 = vpop.f32.mrf.mxu3 }
 0x299   : > { %1073 = vmatpush.msra.mxu1 %v1021_v39  ;;  %v2406_v39 = vmul.f32 %v581_v46, %v2171_v25 }
 0x29b   : > { %1074 = vmatpush.msra.mxu1 %v1018_v38  ;;  %v1133_v38 = vmul.f32 %v2181_v29, %v2181_v29 }
 0x29c   : > { %1622 = vmatmul.msk.f32.vlgmr.msrb.gmra.mxu1 %vm312_vm0, %v2108_v10  ;;  %1632 = vmatmul.msk.f32.vlgmr.msrb.gmra.mxu0 %vm312_vm0, %v2108_v10 }
 0x2a0   : > { %v1024_v40 = vpop.f32.mrf.mxu3 }
 0x2a4   : > { %1623 = vmatmul.msk.f32.gmra.mxu1 %vm312_vm0, %v2112_v12  ;;  %1633 = vmatmul.msk.f32.gmra.mxu0 %vm312_vm0, %v2112_v12 }
 0x2a8   : > { %v1027_v41 = vpop.f32.mrf.mxu3 }
 0x2a9   : > { %1096 = vmatpush.msra.mxu0 %v1027_v41  ;;  %v1176_v41 = vmul.f32 2.0, %v2272_v63 }
 0x2ab   : > { %1097 = vmatpush.msra.mxu0 %v1024_v40  ;;  %v1228_v40 = vadd.f32 0.0001, %v1220_v24  ;;  %v1143_v24 = vmul.f32 %v2365_v50, %v2365_v50 }
 0x2ac   : > { %1634 = vmatmul.msk.f32.vlgmr.msra.gmra.mxu1 %vm312_vm0, %v2108_v10  ;;  %1636 = vmatmul.msk.f32.vlgmr.msra.gmra.mxu0 %vm312_vm0, %v2108_v10 }
 0x2b0   : > { %v1030_v43 = vpop.f32.mrf.mxu3 }
 0x2b4   : > { %1635 = vmatmul.msk.f32.gmra.mxu1 %vm312_vm0, %v2112_v12  ;;  %1637 = vmatmul.msk.f32.gmra.mxu0 %vm312_vm0, %v2112_v12 }
 0x2b8   : > { %v1033_v44 = vpop.f32.mrf.mxu3 }
 0x2b9   : > { %1119 = vmatpush.msrb.mxu1 %v1033_v44 }
 0x2bb   : > { %1120 = vmatpush.msrb.mxu1 %v1030_v43  ;;  %v1219_v43 = vadd.f32 %v1139_v26, %v1131_v32 }
 0x2bc   : > { %1638 = vmatmul.msk.f32.vlgmr.msrb.gmra.mxu1 %vm312_vm0, %v2108_v10 }
 0x2c4   : > { %1639 = vmatmul.msk.f32.gmra.mxu1 %vm312_vm0, %v2112_v12 }
 0x2c9   : > { %v723_v49 = vpop.f32.mrf.mxu0 }
 0x2ca   : > { %v1152_v57 = vsub.f32 %v723_v49, %v2266_v58  ;;  %v1225_v58 = vadd.f32 0.0001, %v2289_v11  ;;  %v1221_v49 = vadd.f32 %v1141_v33, %v1133_v38 }
 0x2d1   : > { %v726_v51 = vpop.f32.mrf.mxu0 }
 0x2d2   : > { %v1153_v8 = vsub.f32 %v726_v51, %v2279_v2  ;;  %v1218_v2 = vadd.f32 %v1138_v17, %v1130_v0 }
 0x2d4   : > { %v1226_v34 = vadd.f32 0.0001, %v1218_v2 }
 0x2d9   : > { %v746_v52 = vpop.f32.mrf.mxu1 }
 0x2da   : > { %v1154_v22 = vsub.f32 %v746_v52, %v1130_v0 }
 0x2e1   : > { %v2367_v54 = vpop.f32.mrf.mxu1 }
 0x2e2   : > { %v1155_v51 = vsub.f32 %v2367_v54, %v1131_v32  ;;  %v2423_v54 = vmul.f32 %v2361_v47, %v2175_v27  ;;  %v1229_v27 = vadd.f32 0.0001, %v1221_v49 }
 0x2e9   : > { %v769_v53 = vpop.f32.mrf.mxu0 }
 0x2ea   : > { %v1156_v14 = vsub.f32 %v769_v53, %v1132_v7  ;;  %v2443_v7 = vmul.f32 2.0, %v2423_v54 }
 0x2f1   : > { %v2369_v55 = vpop.f32.mrf.mxu0 }
 0x2f2   : > { %v1157_v52 = vsub.f32 %v2369_v55, %v1133_v38  ;;  %v1177_v55 = vmul.f32 2.0, %v2285_v5 }
 0x2f4   : > { %v2445_v2 = vadd.f32 0.0001, %v1177_v55 }
 0x2f9   : > { %v2371_v56 = vpop.f32.mrf.mxu1  ;;  %v888_v10 = vpop.f32.mrf.mxu0 }
 0x2fa   : > { %v1160_v12 = vsub.f32 %v888_v10, %v2270_v62 }
 0x2fc   : > { %v1232_v59 = vadd.f32 %v1160_v12, %v1152_v57 }
 0x2fe   : > { %v1240_v61 = vadd.f32 0.0009, %v1232_v59 }
 0x300   : > { %v2376_v1 = vmul.f32 %v1240_v61, %v1224_v60  ;;  %v1134_v60 = vmul.f32 %v2349_v42, %v2349_v42  ;;  %v1178_v61 = vmul.f32 2.0, %v2406_v39 }
 0x301   : > { %v2378_v3 = vpop.f32.mrf.mxu1  ;;  %v891_v4 = vpop.f32.mrf.mxu0 }
 0x302   : > { %v1161_v13 = vsub.f32 %v891_v4, %v2283_v9  ;;  %1713 = vrcp.f32 %v2376_v1  ;;  %v1184_v4 = vadd.f32 0.0001, %v1176_v41  ;;  %vm1261_vm2 = vweird.f32 %v2376_v1 }
 0x304   : > { %v1233_v6 = vadd.f32 %v1161_v13, %v1153_v8  ;;  %v2428_v8 = vmul.f32 %v2302_v15, %v2179_v28  ;;  %v2438_v28 = vmul.f32 %v2355_v45, %v2355_v45  ;;  %v2440_v15 = vadd.f32 0.0001, %v1178_v61 }
 0x306   : > { %v1241_v62 = vadd.f32 0.0009, %v1233_v6 }
 0x308   : > { %v2390_v20 = vmul.f32 %v1241_v62, %v1225_v58  ;;  %v2392_v11 = vpop.eup %1713  ;;  %v1142_v58 = vmul.f32 %v2363_v48, %v2363_v48 }
 0x309   : > { %v911_v9 = vpop.f32.mrf.mxu1  ;;  %v934_v21 = vpop.f32.mrf.mxu0  ;;  %v1257_v37 = vmul.f32 %v2392_v11, %v2376_v1  ;;  %vm1262_vm1 = vweird.f32 %v2392_v11 }
 0x30a   : > { %v1162_v23 = vsub.f32 %v911_v9, %v1138_v17  ;;  %v1164_v16 = vsub.f32 %v934_v21, %v1140_v18  ;;  %1715 = vrcp.f32 %v2390_v20  ;;  %v1227_v17 = vadd.f32 0.0001, %v1219_v43  ;;  %vm2478_vm3 = vmor %vm1261_vm2, %vm1262_vm1 }
 0x30b   : > { %v1258_v59 = vsub.f32 1.0, %v1257_v37  ;;  %v1180_v21 = vmul.f32 2.0, %v2428_v8  ;;  %v1279_v55 = vand.u32 2147483647, %v2390_v20  ;;  %vm1275_vm6 = vweird.f32 %v2390_v20 }
 0x30c   : > { %v1234_v30 = vadd.f32 %v1162_v23, %v1154_v22  ;;  %v1236_v31 = vadd.f32 %v1164_v16, %v1156_v14  ;;  %v2452_v22 = vmul.f32 %v2307_v19, %v2181_v29  ;;  %v1222_v16 = vadd.f32 %v1142_v58, %v1134_v60 }
 0x30d   : > { %v1259_v18 = vmul.f32 %v2392_v11, %v1258_v59  ;;  %v1267_v19 = vand.u32 2147483648, %v2376_v1  ;;  %v2473_v38 = vadd.f32 0.0001, %v1180_v21  ;;  %vm1280_vm8 = vcmp.eq.f32.partialorder %v1279_v55, 8.507059e+37 }
 0x30e   : > { %v1242_v35 = vadd.f32 0.0009, %v1234_v30  ;;  %v1244_v36 = vadd.f32 0.0009, %v1236_v31  ;;  %v1230_v41 = vadd.f32 0.0001, %v1222_v16  ;;  %v1151_v55 = vmul.f32 %v2365_v50, %v2355_v45 }
 0x310   : > { %v2409_v44 = vmul.f32 %v1242_v35, %v1226_v34  ;;  %v2413_v53 = vmul.f32 %v1244_v36, %v1228_v40  ;;  %v2415_v12 = vpop.eup %1715  ;;  %v1260_v35 = vadd.f32 %v2392_v11, %v1259_v18  ;;  %v2476_v40 = vmul.f32 2.0, %v2452_v22 }
 0x311   : > { %v914_v10 = vpop.f32.mrf.mxu1  ;;  %v937_v57 = vpop.f32.mrf.mxu0  ;;  %v1271_v62 = vmul.f32 %v2415_v12, %v2390_v20  ;;  %vm1276_vm5 = vweird.f32 %v2415_v12  ;;  %v2504_v18 = vmul.f32 %v2363_v48, %v2349_v42 }
 0x312   : > { %1717 = vrcp.f32 %v2409_v44  ;;  %v1163_v25 = vsub.f32 %v914_v10, %v1139_v26  ;;  %v1165_v46 = vsub.f32 %v937_v57, %v1141_v33  ;;  %v1158_v26 = vsub.f32 %v2371_v56, %v1134_v60  ;;  %vm2512_vm7 = vmor %vm1275_vm6, %vm1276_vm5 }
 0x313   : > { %1719 = vrcp.f32 %v2413_v53  ;;  %v1272_v32 = vsub.f32 1.0, %v1271_v62  ;;  %v1264_v10 = vsel %vm2478_vm3, %v2392_v11, %v1260_v35  ;;  %v1223_v57 = vadd.f32 %v1143_v24, %v2438_v28 }
 0x314   : > { %v1235_v13 = vadd.f32 %v1163_v25, %v1155_v51  ;;  %v1237_v6 = vadd.f32 %v1165_v46, %v1157_v52  ;;  %v1159_v25 = vsub.f32 %v2378_v3, %v2438_v28  ;;  %v1268_v46 = vor.u32 1.1754944e-38, %v1267_v19 }
 0x315   : > { %v1273_v49 = vmul.f32 %v2415_v12, %v1272_v32  ;;  %v1281_v62 = vand.u32 2147483648, %v2390_v20  ;;  %v1231_v28 = vadd.f32 0.0001, %v1223_v57  ;;  %v1323_v35 = vand.u32 2147483648, %v2413_v53 }
 0x316   : > { %v1243_v47 = vadd.f32 0.0009, %v1235_v13  ;;  %v1245_v0 = vadd.f32 0.0009, %v1237_v6  ;;  %vm1289_vm9 = vweird.f32 %v2409_v44  ;;  %vm1317_vm12 = vweird.f32 %v2413_v53 }
 0x317   : > { %v1282_v32 = vor.u32 1.1754944e-38, %v1281_v62 }
 0x318   : > { %v2447_v9 = vpop.eup %1717  ;;  %v2454_v14 = vmul.f32 %v1243_v47, %v1227_v17  ;;  %v2456_v23 = vmul.f32 %v1245_v0, %v1229_v27 }
 0x319   : > { %v957_v30 = vpop.f32.mrf.mxu1  ;;  %v1053_v31 = vpop.f32.mrf.mxu0  ;;  %v1285_v56 = vmul.f32 %v2447_v9, %v2409_v44  ;;  %vm1290_vm10 = vweird.f32 %v2447_v9 }
 0x31a   : > { %v1166_v33 = vsub.f32 %v957_v30, %v1142_v58  ;;  %v1168_v34 = vsub.f32 %v1053_v31, %v2272_v63  ;;  %v2464_v29 = vpop.eup %1719  ;;  %1721 = vrcp.f32 %v2454_v14  ;;  %v1265_v63 = vand.u32 2147483647, %v2376_v1  ;;  %vm2548_vm14 = vmor %vm1289_vm9, %vm1290_vm10 }
 0x31b   : > { %1723 = vrcp.f32 %v2456_v23  ;;  %v1313_v1 = vmul.f32 %v2464_v29, %v2413_v53  ;;  %v1286_v59 = vsub.f32 1.0, %v1285_v56  ;;  %v1274_v58 = vadd.f32 %v2415_v12, %v1273_v49 }
 0x31c   : > { %v1238_v36 = vadd.f32 %v1166_v33, %v1158_v26  ;;  %v1192_v37 = vmul.f32 2.0, %v1168_v34  ;;  %vm1266_vm4 = vcmp.eq.f32.partialorder %v1265_v63, 8.507059e+37  ;;  %v1321_v34 = vand.u32 2147483647, %v2413_v53 }
 0x31d   : > { %v1269_v17 = vsel %vm1266_vm4, %v1268_v46, %v1264_v10  ;;  %v1314_v0 = vsub.f32 1.0, %v1313_v1  ;;  %v1287_v21 = vmul.f32 %v2447_v9, %v1286_v59  ;;  %v1278_v42 = vsel %vm2512_vm7, %v2415_v12, %v1274_v58 }
 0x31e   : > { %v1246_v51 = vadd.f32 0.0009, %v1238_v36  ;;  %v1200_v52 = vadd.f32 0.0009, %v1192_v37  ;;  %v1295_v12 = vand.u32 2147483648, %v2409_v44  ;;  %v1283_v56 = vsel %vm1280_vm8, %v1282_v32, %v1278_v42 }
 0x31f   : > { %v1315_v33 = vmul.f32 %v2464_v29, %v1314_v0  ;;  %v1288_v36 = vadd.f32 %v2447_v9, %v1287_v21  ;;  %vm1318_vm11 = vweird.f32 %v2464_v29  ;;  %vm2540_vm13 = vcmp.eq.f32.partialorder %v1321_v34, 8.507059e+37 }
 0x320   : > { %v2491_v60 = vmul.f32 %v1246_v51, %v1230_v41  ;;  %v1208_v61 = vmul.f32 %v1200_v52, %v1184_v4  ;;  %v2494_v13 = vpop.eup %1721  ;;  %vm2560_vm15 = vmor %vm1317_vm12, %vm1318_vm11  ;;  %v1296_v62 = vor.u32 1.1754944e-38, %v1295_v12  ;;  %vm1331_vm2 = vweird.f32 %v2456_v23 }
 0x321   : > { %v960_v6 = vpop.f32.mrf.mxu1  ;;  %v1056_v11 = vpop.f32.mrf.mxu0  ;;  %v1299_v20 = vmul.f32 %v2494_v13, %v2454_v14  ;;  %v1316_v1 = vadd.f32 %v2464_v29, %v1315_v33  ;;  %v1292_v53 = vsel %vm2548_vm14, %v2447_v9, %v1288_v36  ;;  %vm1304_vm3 = vweird.f32 %v2494_v13 }
 0x322   : > { %v2499_v3 = vpop.eup %1723  ;;  %v1167_v27 = vsub.f32 %v960_v6, %v1143_v24  ;;  %v1169_v47 = vsub.f32 %v1056_v11, %v2285_v5  ;;  %v1368_v4 = vmul.f32 %v1269_v17, %v1208_v61  ;;  %1725 = vrcp.f32 %v2491_v60 }
 0x323   : > { %v1327_v48 = vmul.f32 %v2499_v3, %v2456_v23  ;;  %v1300_v49 = vsub.f32 1.0, %v1299_v20  ;;  %v1320_v9 = vsel %vm2560_vm15, %v2464_v29, %v1316_v1  ;;  %vm1332_vm4 = vweird.f32 %v2499_v3 }
 0x324   : > { %v1239_v16 = vadd.f32 %v1167_v27, %v1159_v25  ;;  %v1193_v26 = vmul.f32 2.0, %v1169_v47  ;;  %v1376_v30 = vsel %vm312_vm0, %v1368_v4, 0.0  ;;  %v1324_v25 = vor.u32 1.1754944e-38, %v1323_v35  ;;  %vm2595_vm6 = vmor %vm1331_vm2, %vm1332_vm4 }
 0x325   : > { %1377 = vadd.xlane.f32.xlu0 %v1376_v30  ;;  %v1328_v43 = vsub.f32 1.0, %v1327_v48  ;;  %v1335_v27 = vand.u32 2147483647, %v2456_v23  ;;  %v1337_v20 = vand.u32 2147483648, %v2456_v23  ;;  %vm1303_vm5 = vweird.f32 %v2454_v14 }
 0x326   : > { %v1247_v24 = vadd.f32 0.0009, %v1239_v16  ;;  %v1201_v31 = vadd.f32 0.0009, %v1193_v26  ;;  %v1325_v29 = vsel %vm2540_vm13, %v1324_v25, %v1320_v9  ;;  %v1187_v35 = vadd.f32 0.0001, %v2443_v7  ;;  %vm2606_vm7 = vmor %vm1303_vm5, %vm1304_vm3 }
 0x327   : > { %v1329_v6 = vmul.f32 %v2499_v3, %v1328_v43  ;;  %v1189_v12 = vadd.f32 0.0001, %v2476_v40  ;;  %vm1336_vm8 = vcmp.eq.f32.partialorder %v1335_v27, 8.507059e+37  ;;  %vm1345_vm11 = vweird.f32 %v2491_v60 }
 0x328   : > { %v1209_v19 = vmul.f32 %v1201_v31, %v2445_v2  ;;  %v2531_v37 = vmul.f32 %v1247_v24, %v1231_v28  ;;  %v2534_v51 = vpop.eup %1725  ;;  %v1307_v24 = vand.u32 2147483647, %v2454_v14  ;;  %v1309_v31 = vand.u32 2147483648, %v2454_v14 }
 0x329   : > { %v1076_v63 = vpop.f32.mrf.mxu1  ;;  %v1099_v41 = vpop.f32.mrf.mxu0  ;;  %v1341_v11 = vmul.f32 %v2534_v51, %v2491_v60  ;;  %v1330_v16 = vadd.f32 %v2499_v3, %v1329_v6  ;;  %vm1346_vm10 = vweird.f32 %v2534_v51  ;;  %v1183_v9 = vmul.f32 2.0, %v1151_v55 }
 0x32a   : > { %v1170_v52 = vsub.f32 %v1076_v63, %v2406_v39  ;;  %v1172_v10 = vsub.f32 %v1099_v41, %v2428_v8  ;;  %v1369_v2 = vmul.f32 %v1283_v56, %v1209_v19  ;;  %v1293_v39 = vand.u32 2147483647, %v2409_v44  ;;  %vm1347_vm12 = vmor %vm1345_vm11, %vm1346_vm10 }
 0x32b   : > { %1727 = vrcp.f32 %v2531_v37  ;;  %v1301_v44 = vmul.f32 %v2494_v13, %v1300_v49  ;;  %v1342_v30 = vsub.f32 1.0, %v1341_v11  ;;  %v1334_v14 = vsel %vm2595_vm6, %v2499_v3, %v1330_v16 }
 0x32c   : > { %v1194_v8 = vmul.f32 2.0, %v1170_v52  ;;  %v1196_v59 = vmul.f32 2.0, %v1172_v10  ;;  %v1379_v61 = vsel %vm312_vm0, %v1369_v2, 0.0  ;;  %vm1294_vm1 = vcmp.eq.f32.partialorder %v1293_v39, 8.507059e+37 }
 0x32d   : > { %1380 = vadd.xlane.f32.xlu0 %v1379_v61  ;;  %v1297_v0 = vsel %vm1294_vm1, %v1296_v62, %v1292_v53  ;;  %v1302_v26 = vadd.f32 %v2494_v13, %v1301_v44  ;;  %v1343_v23 = vmul.f32 %v2534_v51, %v1342_v30  ;;  %v1182_v63 = vmul.f32 2.0, %v2504_v18 }
 0x32e   : > { %v1202_v17 = vadd.f32 0.0009, %v1194_v8  ;;  %v1204_v58 = vadd.f32 0.0009, %v1196_v59  ;;  %v1338_v3 = vor.u32 1.1754944e-38, %v1337_v20  ;;  %v1310_v41 = vor.u32 1.1754944e-38, %v1309_v31 }
 0x32f   : > { %v1306_v7 = vsel %vm2606_vm7, %v2494_v13, %v1302_v26  ;;  %vm1308_vm9 = vcmp.eq.f32.partialorder %v1307_v24, 8.507059e+37  ;;  %v1344_v1 = vadd.f32 %v2534_v51, %v1343_v23  ;;  %v1351_v39 = vand.u32 2147483648, %v2491_v60 }
 0x330   : > { %v1210_v47 = vmul.f32 %v1202_v17, %v2440_v15  ;;  %v1212_v4 = vmul.f32 %v1204_v58, %v2473_v38  ;;  %v1339_v10 = vsel %vm1336_vm8, %v1338_v3, %v1334_v14  ;;  %v1311_v2 = vsel %vm1308_vm9, %v1310_v41, %v1306_v7 }
 0x331   : > { %v1079_v28 = vpop.f32.mrf.mxu1  ;;  %v1102_v21 = vpop.f32.mrf.mxu0  ;;  %v1349_v53 = vand.u32 2147483647, %v2491_v60  ;;  %v1348_v44 = vsel %vm1347_vm12, %v2534_v51, %v1344_v1  ;;  %v1352_v17 = vor.u32 1.1754944e-38, %v1351_v39  ;;  %v1365_v45 = vand.u32 2147483648, %v2531_v37 }
 0x332   : > { %v1171_v5 = vsub.f32 %v1079_v28, %v2423_v54  ;;  %v1173_v42 = vsub.f32 %v1102_v21, %v2452_v22  ;;  %v1372_v15 = vmul.f32 %v1325_v29, %v1212_v4  ;;  %v1370_v48 = vmul.f32 %v1297_v0, %v1210_v47  ;;  %v2583_v38 = vpop.eup %1727 }
 0x333   : > { %v1355_v40 = vmul.f32 %v2583_v38, %v2531_v37  ;;  %vm1350_vm13 = vcmp.eq.f32.partialorder %v1349_v53, 8.507059e+37  ;;  %vm1360_vm14 = vweird.f32 %v2583_v38  ;;  %vm1359_vm15 = vweird.f32 %v2531_v37 }
 0x334   : > { %v1195_v32 = vmul.f32 2.0, %v1171_v5  ;;  %v1197_v33 = vmul.f32 2.0, %v1173_v42  ;;  %v1388_v34 = vsel %vm312_vm0, %v1372_v15, 0.0  ;;  %v1382_v54 = vsel %vm312_vm0, %v1370_v48, 0.0  ;;  %vm1361_vm1 = vmor %vm1359_vm15, %vm1360_vm14 }
 0x335   : > { %1389 = vadd.xlane.f32.xlu2 %v1388_v34  ;;  %1383 = vadd.xlane.f32.xlu1 %v1382_v54  ;;  %v1356_v46 = vsub.f32 1.0, %v1355_v40  ;;  %v1353_v27 = vsel %vm1350_vm13, %v1352_v17, %v1348_v44  ;;  %v1363_v51 = vand.u32 2147483647, %v2531_v37  ;;  %v1191_v28 = vadd.f32 0.0001, %v1183_v9 }
 0x336   : > { %v1203_v56 = vadd.f32 0.0009, %v1195_v32  ;;  %v1205_v36 = vadd.f32 0.0009, %v1197_v33  ;;  %v1366_v16 = vor.u32 1.1754944e-38, %v1365_v45  ;;  %v1408_v24 = vlaneseq }
 0x337   : > { %v1357_v11 = vmul.f32 %v2583_v38, %v1356_v46  ;;  %vm1364_vm2 = vcmp.eq.f32.partialorder %v1363_v51, 8.507059e+37  ;;  %vm1413_vm3 = vcmask 130112   ;;  %vm1424_vm4 = vcmask 1041409  }
 0x338   : > { %v1211_v43 = vmul.f32 %v1203_v56, %v1187_v35  ;;  %v1213_v49 = vmul.f32 %v1205_v36, %v1189_v12  ;;  %v1409_v31 = vand.u32 127, %v1408_v24  ;;  %vm1428_vm5 = vcmask 1043459  }
 0x339   : > { %v1122_v52 = vpop.f32.mrf.mxu1  ;;  %v1358_v4 = vadd.f32 %v2583_v38, %v1357_v11  ;;  %vm1431_vm6 = vcmask 125952   ;;  %vm1435_vm7 = vcmask 3072  }
 0x33a   : > { %v1174_v13 = vsub.f32 %v1122_v52, %v2504_v18  ;;  %v1373_v57 = vmul.f32 %v1339_v10, %v1213_v49  ;;  %v1371_v25 = vmul.f32 %v1311_v2, %v1211_v43  ;;  %v1190_v18 = vadd.f32 0.0001, %v1182_v63 }
 0x33b   : > { %v1362_v29 = vsel %vm1361_vm1, %v2583_v38, %v1358_v4  ;;  %v1411_v33 = vadd.s32 4294967288, %v1409_v31 }
 0x33c   : > { %v1198_v8 = vmul.f32 2.0, %v1174_v13  ;;  %v1391_v59 = vsel %vm312_vm0, %v1373_v57, 0.0  ;;  %v1385_v61 = vsel %vm312_vm0, %v1371_v25, 0.0  ;;  %v1367_v30 = vsel %vm1364_vm2, %v1366_v16, %v1362_v29 }
 0x33d   : > { %1392 = vadd.xlane.f32.xlu2 %v1391_v59  ;;  %1386 = vadd.xlane.f32.xlu1 %v1385_v61 }
 0x33e   : > { %v1206_v6 = vadd.f32 0.0009, %v1198_v8 }
 0x340   : > { %v1214_v58 = vmul.f32 %v1206_v6, %v1190_v18 }
 0x341   : > { %v1125_v62 = vpop.f32.mrf.mxu1 }
 0x342   : > { %v1175_v47 = vsub.f32 %v1125_v62, %v1151_v55  ;;  %v1374_v60 = vmul.f32 %v1353_v27, %v1214_v58 }
 0x344   : > { %v1199_v50 = vmul.f32 2.0, %v1175_v47  ;;  %v1394_v0 = vsel %vm312_vm0, %v1374_v60, 0.0 }
 0x345   : > { %1395 = vadd.xlane.f32.xlu0 %v1394_v0 }
 0x346   : > { %v1207_v21 = vadd.f32 0.0009, %v1199_v50 }
 0x348   : > { %v1215_v26 = vmul.f32 %v1207_v21, %v1191_v28 }
 0x34a   : > { %v1375_v5 = vmul.f32 %v1367_v30, %v1215_v26 }
 0x34c   : > { %v1397_v42 = vsel %vm312_vm0, %v1375_v5, 0.0  ;;  %vm1426_vm0 = vcmask 1042434  }
 0x34d   : > { %1398 = vadd.xlane.f32.xlu1 %v1397_v42 }
 0x398   : > { %v1378_v15 = vpop.xlane.xlu0 %1377 }
 0x399   : > { %v1410_v12 = vperm.slane %v1378_v15, %v1409_v31 }
 0x3a0   : > { %v1381_v37 = vpop.xlane.xlu0 %1380 }
 0x3a1   : > { %v1412_v22 = vperm.slane %v1381_v37, %v1411_v33 }
 0x3a3   : > { %v1414_v56 = vsel %vm1413_vm3, %v1412_v22, %v1410_v12 }
 0x3a8   : > { %v1384_v48 = vpop.xlane.xlu1 %1383  ;;  %v1390_v20 = vpop.xlane.xlu2 %1389 }
 0x3a9   : > { %v1415_v38 = vperm.slane %v1384_v48, %v1409_v31  ;;  %v1418_v19 = vperm.slane %v1390_v20, %v1409_v31 }
 0x3b0   : > { %v1387_v32 = vpop.xlane.xlu1 %1386  ;;  %v1393_v34 = vpop.xlane.xlu2 %1392 }
 0x3b1   : > { %v1416_v54 = vperm.slane %v1387_v32, %v1411_v33  ;;  %v1419_v35 = vperm.slane %v1393_v34, %v1411_v33 }
 0x3b3   : > { %v1417_v14 = vsel %vm1413_vm3, %v1416_v54, %v1415_v38  ;;  %v1420_v36 = vsel %vm1413_vm3, %v1419_v35, %v1418_v19 }
 0x3b4   : > { %v1425_v40 = vsel %vm1424_vm4, %v1417_v14, %v1414_v56 }
 0x3b5   : > { %v1427_v43 = vsel %vm1426_vm0, %v1420_v36, %v1425_v40 }
 0x3b8   : > { %v1396_v23 = vpop.xlane.xlu0 %1395 }
 0x3b9   : > { %v1421_v63 = vperm.slane %v1396_v23, %v1409_v31 }
 0x3c0   : > { %v1399_v7 = vpop.xlane.xlu1 %1398 }
 0x3c1   : > { %v1422_v3 = vperm.slane %v1399_v7, %v1411_v33 }
 0x3c3   : > { %v1423_v41 = vsel %vm1413_vm3, %v1422_v3, %v1421_v63 }
 0x3c4   : > { %v1429_v49 = vsel %vm1428_vm5, %v1423_v41, %v1427_v43 }
 0x3c5   : > { %v1432_v52 = vsel %vm1431_vm6, %v1429_v49, 0.0 }
 0x3c6   : > { %1433 = vadd.xlane.f32.xlu2 %v1432_v52 }
 0x439   : > { %v1434_v10 = vpop.xlane.xlu2 %1433 }
 0x43a   : > { %1436 = vst.msk [vmem:[%s291_s29] sm:$0xf] %vm1435_vm7, %v1434_v10 }
 0x43b PF: > { %p13_p4 = scmp.ge.s32.totalorder %s1969_s28, 4   ;;  %s2689_s15 = smov %s1883_s16 }
 0x43c   : > { %s2690_s16 = smov %s1887_s17  ;;  %s2691_s17 = smov %s1984_s7 }
 0x43d   : > { %s2692_s18 = smov %s1969_s28  ;;  %15 = sbr.rel (!%p13_p4) target bundleno = 5 (0x5), region = 94 }
 0x442   :  { %1456 = vsyncpa [#allocation3], 1 }
 0x443   :  { %1458 = vsyncpa [#allocation3 + $0x1], 1 }
 0x444   :  { %1459 = vsyncpa [#allocation5], 1 }

</bundles_post_ra>
